<compile_context>
chip_gen: v6e
topology: v6e:2x2x1
jax: 0.10.0
libtpu: 0.0.40
codegen_flags: <defaults>
</compile_context>

<pallas_src>
import functools

import numpy as np
import jax
import jax.numpy as jnp
from jax import lax
from jax.experimental import pallas as pl
from jax.experimental.pallas import tpu as pltpu

EPS = 1e-5
_NT_DIMS = (((1,), (1,)), ((), ()))   # contract the last dim of both operands


def mrpcen_kernel(x_ref, w_ref, p_ref, o_ref):
    """One batch element, all S smoothing rates, lane-dense (..., F) layout.

    x_ref : VMEM (F, T)          input energies (assumed non-negative)
    w_ref : VMEM ((S+1)*T, T)    S stacked IIR matrices + trailing identity
    p_ref : VMEM (4, F)          rows: [-exp(alpha), exp(delta), exp(r), delta**r]
    o_ref : VMEM (S, T, F)       output tile (-> out[b]), lane-dense along F
    """
    n_rates, t_len, n_bands = o_ref.shape

    # Single MXU call: rows [0, S*T) give the IIR smoothers for every rate,
    # rows [S*T, (S+1)*T) multiply by the identity and hand back x^T already
    # in the lane-dense orientation.
    full = lax.dot_general(w_ref[...], x_ref[...], _NT_DIMS,
                           preferred_element_type=jnp.float32)
    full = full.reshape(n_rates + 1, t_len, n_bands)   # free leading-axis split
    sm = full[:n_rates]                                 # (S, T, F) smoothers
    x_t = full[n_rates:]                                # (1, T, F) == x^T

    p = p_ref[...]                                      # (4, F)
    neg_alpha = p[0:1].reshape(1, 1, n_bands)
    delta = p[1:2].reshape(1, 1, n_bands)
    r = p[2:3].reshape(1, 1, n_bands)
    dr = p[3:4].reshape(1, 1, n_bands)

    # exp(-alpha*(log(eps)+log1p(sm/eps))) == exp(-alpha*log(sm+eps))
    smooth = jnp.exp(neg_alpha * jnp.log(sm + EPS))
    base = x_t * smooth + delta                   # > 0 because x >= 0, delta > 0
    o_ref[...] = jnp.exp(r * jnp.log(base)) - dr


@functools.lru_cache(maxsize=None)
def _iir_matrix_stacked(t_values, T):
    """Host-side build of W_ext, shape ((S+1)*T, T).

    Row s*T + t holds W_s[t, :] with
        W_s[t, 0] = (1-s)^t,  W_s[t, k] = s*(1-s)^(t-k) for 1 <= k <= t, else 0,
    so dot_general(W_ext, x, NT) reproduces the first-order IIR recurrence.
    The trailing T rows are the identity, which makes the same matmul return
    x^T (lane-dense) at no extra cost.  Cached across calls.
    """
    S = len(t_values)
    idx = np.arange(T)
    diff = idx[:, None] - idx[None, :]                       # t - k
    mask = diff >= 0
    out = np.zeros(((S + 1) * T, T), dtype=np.float32)
    for si, t in enumerate(t_values):
        t = float(t)
        s = (np.sqrt(1.0 + 4.0 * t * t) - 1.0) / (2.0 * t * t)
        gain = np.where(idx[None, :] == 0, 1.0, s)           # k==0 -> 1, else s
        out[si * T:(si + 1) * T] = np.where(
            mask, (1.0 - s) ** np.maximum(diff, 0) * gain, 0.0)
    out[S * T:] = np.eye(T, dtype=np.float32)
    return out


def mrpcen_pallas(x, alpha_p, delta_p, r_p, t_values):
    """x: (B, F, T) float32 energies; params: (F,) log-space; t_values: list.

    Returns (B, S, F, T), matching MRPCEN.forward.
    """
    B, F, T = x.shape
    S = len(t_values)

    w = jnp.asarray(_iir_matrix_stacked(tuple(float(t) for t in t_values), T))

    # Parameters are stored in log-space (as in nn.Parameter init); exp here
    # and hoist the grid-invariant pieces (-alpha, delta**r) into one
    # lane-dense (4, F) tile.
    alpha = jnp.exp(alpha_p).astype(jnp.float32)
    delta = jnp.exp(delta_p).astype(jnp.float32)
    r = jnp.exp(r_p).astype(jnp.float32)
    params = jnp.stack([-alpha, delta, r, delta ** r], axis=0)     # (4, F)

    cost = pl.CostEstimate(
        flops=2 * B * (S + 1) * T * T * F,
        transcendentals=4 * B * S * T * F,        # 2x exp + 2x log per element
        bytes_accessed=4 * (B * F * T + (S + 1) * T * T + 4 * F + B * S * T * F),
    )

    out_tf = pl.pallas_call(
        mrpcen_kernel,
        out_shape=jax.ShapeDtypeStruct((B, S, T, F), jnp.float32),
        grid_spec=pltpu.PrefetchScalarGridSpec(
            num_scalar_prefetch=0,
            grid=(B,),
            in_specs=[
                pl.BlockSpec((None, F, T), lambda b: (b, 0, 0)),      # x[b]
                pl.BlockSpec(((S + 1) * T, T), lambda b: (0, 0)),     # W_ext
                pl.BlockSpec((4, F), lambda b: (0, 0)),               # packed params
            ],
            out_specs=pl.BlockSpec((None, S, T, F), lambda b: (b, 0, 0, 0)),
        ),
        compiler_params=pltpu.CompilerParams(
            dimension_semantics=("parallel",)),
        cost_estimate=cost,
    )(x.astype(jnp.float32), w, params)

    # lane-dense kernel layout (B, S, T, F) -> module layout (B, S, F, T)
    return jnp.transpose(out_tf, (0, 1, 3, 2))


def mrpcen_ref(x, alpha_p, delta_p, r_p, t_values):
    """Pure-JAX replica of the PyTorch forward (for correctness check)."""
    alpha = jnp.exp(alpha_p)[:, None]
    delta = jnp.exp(delta_p)[:, None]
    r = jnp.exp(r_p)[:, None]
    outs = []
    for t in t_values:
        s = np.float32((np.sqrt(1.0 + 4.0 * t ** 2) - 1.0) / (2.0 * t ** 2))
        sm = [x[..., 0]]
        for fr in range(1, x.shape[-1]):
            sm.append((1.0 - s) * sm[-1] + s * x[..., fr])
        sm = jnp.stack(sm, -1)
        smooth = jnp.exp(-alpha * (jnp.log(jnp.float32(EPS)) +
                                   jnp.log1p(sm / EPS)))
        outs.append((x * smooth + delta) ** r - delta ** r)
    out = jnp.stack(outs)                       # (S, B, F, T)
    out = jnp.squeeze(out)                      # no-op for these shapes
    return jnp.transpose(out, (1, 0, 2, 3))     # (B, S, F, T)


if __name__ == "__main__":
    B, F, T = 2, 128, 16                        # batch, n_bands, time frames
    t_values = [2.0, 4.0, 8.0]                  # S = 3 smoothing rates

    key = jax.random.PRNGKey(0)
    # spectrogram-like non-negative energies (PCEN assumes x >= 0)
    x = jax.random.uniform(key, (B, F, T), dtype=jnp.float32) * 5.0 + 0.1

    # deterministic parameter init, exactly as in MRPCEN.__init__
    alpha_p = jnp.full((F,), float(np.log(0.8)), dtype=jnp.float32)
    delta_p = jnp.full((F,), float(np.log(10.0)), dtype=jnp.float32)
    r_p = jnp.full((F,), float(np.log(0.25)), dtype=jnp.float32)

    out = mrpcen_pallas(x, alpha_p, delta_p, r_p, t_values)
    out = jax.block_until_ready(out)

    ref = mrpcen_ref(x, alpha_p, delta_p, r_p, t_values)
    assert out.shape == (B, len(t_values), F, T), out.shape
    np.testing.assert_allclose(np.asarray(out), np.asarray(ref),
                               rtol=1e-4, atol=1e-4)
    print("KERNEL_OK")
</pallas_src>

<mosaic_0001>
module attributes {stable_mosaic.version = 11 : i64} {
  func.func @mrpcen_kernel(%arg0: i32, %arg1: memref<1x128x16xf32, #tpu.memory_space<vmem>>, %arg2: memref<64x16xf32, #tpu.memory_space<vmem>>, %arg3: memref<4x128xf32, #tpu.memory_space<vmem>>, %arg4: memref<1x3x16x128xf32, #tpu.memory_space<vmem>>) attributes {dimension_semantics = [#tpu.dimension_semantics<parallel>], iteration_bounds = array<i64: 2>, scalar_prefetch = 0 : i64, scratch_operands = 0 : i64, tpu.core_type = #tpu.core_type<tc>, window_params = [{transform_indices = @transform_0, window_bounds = array<i64: 1, 128, 16>}, {pipeline_mode = #tpu.pipeline_mode<synchronous>, transform_indices = @transform_1, window_bounds = array<i64: 64, 16>}, {pipeline_mode = #tpu.pipeline_mode<synchronous>, transform_indices = @transform_2, window_bounds = array<i64: 4, 128>}, {transform_indices = @transform_3, window_bounds = array<i64: 1, 3, 16, 128>}]} {
    %c0 = arith.constant 0 : index
    %c0_0 = arith.constant 0 : index
    %0 = vector.load %arg2[%c0, %c0_0] : memref<64x16xf32, #tpu.memory_space<vmem>>, vector<64x16xf32>
    %c0_1 = arith.constant 0 : index
    %c0_2 = arith.constant 0 : index
    %c0_3 = arith.constant 0 : index
    %1 = vector.load %arg1[%c0_1, %c0_2, %c0_3] : memref<1x128x16xf32, #tpu.memory_space<vmem>>, vector<1x128x16xf32>
    %2 = vector.shape_cast %1 : vector<1x128x16xf32> to vector<128x16xf32>
    %cst = arith.constant dense<0.000000e+00> : vector<64x128xf32>
    %3 = tpu.matmul %0, %2, %cst {dimension_numbers = #tpu.dot_dimension_numbers<[1], [1], [0], [0], [0, 0, 1, 0], [], []>} : vector<64x16xf32>, vector<128x16xf32>, vector<64x128xf32> -> vector<64x128xf32>
    %4 = vector.shape_cast %3 : vector<64x128xf32> to vector<4x16x128xf32>
    %5 = vector.extract_strided_slice %4 {offsets = [0, 0, 0], sizes = [3, 16, 128], strides = [1, 1, 1]} : vector<4x16x128xf32> to vector<3x16x128xf32>
    %6 = vector.extract_strided_slice %4 {offsets = [3, 0, 0], sizes = [1, 16, 128], strides = [1, 1, 1]} : vector<4x16x128xf32> to vector<1x16x128xf32>
    %c0_4 = arith.constant 0 : index
    %c0_5 = arith.constant 0 : index
    %7 = vector.load %arg3[%c0_4, %c0_5] : memref<4x128xf32, #tpu.memory_space<vmem>>, vector<4x128xf32>
    %8 = vector.extract_strided_slice %7 {offsets = [0, 0], sizes = [1, 128], strides = [1, 1]} : vector<4x128xf32> to vector<1x128xf32>
    %9 = vector.shape_cast %8 : vector<1x128xf32> to vector<1x1x128xf32>
    %10 = vector.extract_strided_slice %7 {offsets = [1, 0], sizes = [1, 128], strides = [1, 1]} : vector<4x128xf32> to vector<1x128xf32>
    %11 = vector.shape_cast %10 : vector<1x128xf32> to vector<1x1x128xf32>
    %12 = vector.extract_strided_slice %7 {offsets = [2, 0], sizes = [1, 128], strides = [1, 1]} : vector<4x128xf32> to vector<1x128xf32>
    %13 = vector.shape_cast %12 : vector<1x128xf32> to vector<1x1x128xf32>
    %14 = vector.extract_strided_slice %7 {offsets = [3, 0], sizes = [1, 128], strides = [1, 1]} : vector<4x128xf32> to vector<1x128xf32>
    %15 = vector.shape_cast %14 : vector<1x128xf32> to vector<1x1x128xf32>
    %cst_6 = arith.constant 9.99999974E-6 : f32
    %16 = vector.broadcast %cst_6 : f32 to vector<3x16x128xf32>
    %17 = arith.addf %5, %16 : vector<3x16x128xf32>
    %18 = math.log %17 : vector<3x16x128xf32>
    %19 = vector.broadcast %9 : vector<1x1x128xf32> to vector<3x16x128xf32>
    %20 = arith.mulf %19, %18 : vector<3x16x128xf32>
    %21 = math.exp %20 : vector<3x16x128xf32>
    %22 = vector.broadcast %6 : vector<1x16x128xf32> to vector<3x16x128xf32>
    %23 = arith.mulf %22, %21 : vector<3x16x128xf32>
    %24 = vector.broadcast %11 : vector<1x1x128xf32> to vector<3x16x128xf32>
    %25 = arith.addf %23, %24 : vector<3x16x128xf32>
    %26 = math.log %25 : vector<3x16x128xf32>
    %27 = vector.broadcast %13 : vector<1x1x128xf32> to vector<3x16x128xf32>
    %28 = arith.mulf %27, %26 : vector<3x16x128xf32>
    %29 = math.exp %28 : vector<3x16x128xf32>
    %30 = vector.broadcast %15 : vector<1x1x128xf32> to vector<3x16x128xf32>
    %31 = arith.subf %29, %30 : vector<3x16x128xf32>
    %c0_7 = arith.constant 0 : index
    %c0_8 = arith.constant 0 : index
    %c0_9 = arith.constant 0 : index
    %c0_10 = arith.constant 0 : index
    %32 = vector.load %arg4[%c0_7, %c0_8, %c0_9, %c0_10] : memref<1x3x16x128xf32, #tpu.memory_space<vmem>>, vector<1x3x16x128xf32>
    %33 = vector.shape_cast %32 : vector<1x3x16x128xf32> to vector<3x16x128xf32>
    %34 = vector.shape_cast %31 : vector<3x16x128xf32> to vector<1x3x16x128xf32>
    tpu.vector_store %arg4[%c0_7, %c0_8, %c0_9, %c0_10], %34 {strides = array<i32>} : memref<1x3x16x128xf32, #tpu.memory_space<vmem>>, vector<1x3x16x128xf32>,
    return
  }
  func.func @transform_0(%arg0: i32) -> (i32, i32, i32) {
    %c0_i32 = arith.constant 0 : i32
    %c0_i32_0 = arith.constant 0 : i32
    %c0_i32_1 = arith.constant 0 : i32
    return %arg0, %c0_i32, %c0_i32_0 : i32, i32, i32
  }
  func.func @transform_1(%arg0: i32) -> (i32, i32) {
    %c0_i32 = arith.constant 0 : i32
    %c0_i32_0 = arith.constant 0 : i32
    %c0_i32_1 = arith.constant 0 : i32
    return %c0_i32, %c0_i32_0 : i32, i32
  }
  func.func @transform_2(%arg0: i32) -> (i32, i32) {
    %c0_i32 = arith.constant 0 : i32
    %c0_i32_0 = arith.constant 0 : i32
    %c0_i32_1 = arith.constant 0 : i32
    return %c0_i32, %c0_i32_0 : i32, i32
  }
  func.func @transform_3(%arg0: i32) -> (i32, i32, i32, i32) {
    %c0_i32 = arith.constant 0 : i32
    %c0_i32_0 = arith.constant 0 : i32
    %c0_i32_1 = arith.constant 0 : i32
    %c0_i32_2 = arith.constant 0 : i32
    return %arg0, %c0_i32, %c0_i32_0, %c0_i32_1 : i32, i32, i32, i32
  }
}

</mosaic_0001>

<bundles_post_ra>
// kernel: tpu_custom_call.1
= control target key start
LH: loop header
LB: loop body
LE: loop exit
PB: predicated region body
PF: predicated region fallthrough
CT: control target
= control target key end

     0   :  { %8 = vsyncpa [#allocation3], 0  ;;  %s1095_s0 = inlined_call_operand.vmem [shape: f32[2,128,16], index: 0, kind: input, shape index: {}]   ;;  %s1096_s1 = inlined_call_operand.vmem [shape: f32[64,16], index: 1, kind: input, shape index: {}]   ;;  %s1097_s2 = inlined_call_operand.vmem [shape: f32[4,128], index: 2, kind: input, shape index: {}]   ;;  %s1098_s3 = inlined_call_operand.hbm [shape: f32[2,3,16,128], index: 3, kind: output, shape index: {}]  }
   0x1   :  { %10 = vsyncpa [#allocation3 + $0x1], 0  ;;  %s864_s12 = smov 0   ;;  %s866_s13 = smov 0  }
   0x2   :  { %s868_s14 = smov 0   ;;  %s870_s15 = smov 0  }
   0x3 LB: > { %s885_s16 = sadd.s32 4294967295, %s839_s15   ;;  %s554_s17 = sadd.s32 4294967294, %s839_s15   ;;  %s839_s15 = sphi %s870_s15, %s1104_s15   ;;  %s835_s14 = sphi %s868_s14, %s1103_s14   ;;  %s831_s13 = sphi %s866_s13, %s1102_s13   ;;  %s827_s12 = sphi %s864_s12, %s1101_s12  }
   0x4   : > { %s889_s18 = sadd.s32 1, %s839_s15   ;;  %s91_s19 = sadd.s32 1, %s835_s14 }
   0x5   : > { %s88_s20 = ssub.s32 %s839_s15, %s889_s18  ;;  %p101_p0 = scmp.ne.s32.totalorder %s835_s14, %s831_s13 }
   0x6   : > { %p89_p1 = scmp.eq.s32.totalorder %s88_s20, 0  ;;  %p102_p2 = scmp.eq.s32.totalorder %s885_s16, 1 }
   0x7   : > { %p107_p3 = scmp.ne.s32.totalorder %s831_s13, %s827_s12  ;;  %p108_p4 = scmp.eq.s32.totalorder %s554_s17, 1 }
   0x8   : > { %s900_s21 = scalar_select %p89_p1, %s835_s14, %s91_s19  }
   0x9   : > { %p902_p5 = por %p102_p2, %p101_p0  ;;  %p906_p6 = por %p108_p4, %p107_p3 }
   0xa   : > { %p557_p7 = scmp.ge.s32.totalorder %s839_s15, 1  ;;  %p140_p8 = scmp.lt.s32.totalorder %s839_s15, 3 }
   0xc   : > { %p141_p9 = pnand %p557_p7, %p140_p8 }
   0xd   : > { %p164_p10 = scmp.lt.s32.totalorder (!%p141_p9), %s885_s16, 1  ;;  %s689_s4 = smul.u32 (!%p141_p9), 768, %s885_s16 }
   0xe   : > { %144 = sbr.rel (%p141_p9) target bundleno = 377 (0x179), region = 32  ;;  %s841_s11 = smov (!%p141_p9), [#allocation2]  }
   0xf   : > { %s1051_s9 = scalar_lea.hbm (!%p141_p9), %s1098_s3, %s689_s4  ;;  %s783_s17 = sshll.u32 (!%p141_p9), %s841_s11, 4  ;;  %s784_s17 = int_to_ptr.vmem [resolvable:$false] %s783_s17 }
  0x10   : > { %s785_s19 = scalar_lea.vmem (!%p141_p9), %s784_s17, 1536 }
  0x13   : > { %vm193_vm0 = vcmask 130048   ;;  %v169_v0 = vld [vmem:[%s1096_s1] sm:$0xff]  ;;  %s165_s28 = scalar_select %p164_p10, %s885_s16, 1  ;;  %v170_v18 = vld [vmem:[%s1096_s1 + $0x8] sm:$0xff]  ;;  %v171_v20 = vld [vmem:[%s1096_s1 + $0x10] sm:$0xff]  ;;  %v390_v30 = vlaneseq }
  0x14   : > { %v173_v1 = vld [vmem:[%s1096_s1 + $0x20] sm:$0xff]  ;;  %644 = vmatprep.mubr.msk.f32.mxu0 %vm193_vm0, %v169_v0  ;;  %v174_v19 = vld [vmem:[%s1096_s1 + $0x28] sm:$0xff]  ;;  %v175_v21 = vld [vmem:[%s1096_s1 + $0x30] sm:$0xff] }
  0x15   : > { %650 = vmatprep.mubr.msk.f32.mxu1 %vm193_vm0, %v173_v1  ;;  %s587_s29 = sshll.u32 %s165_s28, 7  ;;  %v172_v22 = vld [vmem:[%s1096_s1 + $0x18] sm:$0xff]  ;;  %v1031_v36 = vshrl.u32 %v390_v30, 7  ;;  %v1037_v39 = vld [vmem:[%s1097_s2] sm:$0xf] }
  0x16   : > { %s925_s5 = scalar_lea.vmem %s1095_s0, %s587_s29  ;;  %v176_v23 = vld [vmem:[%s1096_s1 + $0x38] sm:$0xff]  ;;  %s161_s29 = sand.u32 1, %s831_s13  }
  0x17   : > { %v192_v2 = vld [vmem:[%s925_s5 + $0x78] sm:$0xff]  ;;  %v191_v3 = vld [vmem:[%s925_s5 + $0x70] sm:$0xff]  ;;  %v190_v4 = vld [vmem:[%s925_s5 + $0x68] sm:$0xff]  ;;  %v392_v38 = vsub.s32 0, %v1031_v36  ;;  %v420_v1 = vsub.s32 1, %v1031_v36  ;;  %s688_s30 = smul.u32 48, %s161_s29 }
  0x18   : > { %612 = vmatprep.subr.msk.mxu0 %vm193_vm0, %v192_v2  ;;  %656 = vmatprep.subr.msk.mxu1 %vm193_vm0, %v192_v2  ;;  %v189_v5 = vld [vmem:[%s925_s5 + $0x60] sm:$0xff]  ;;  %v188_v6 = vld [vmem:[%s925_s5 + $0x58] sm:$0xff]  ;;  %v187_v7 = vld [vmem:[%s925_s5 + $0x50] sm:$0xff]  ;;  %s1055_s16 = scalar_lea.sflag [#allocation3], %s161_s29 }
  0x19   : > { %613 = vmatpush3.xpose.msk.msra.mxu0 %vm193_vm0, %v192_v2  ;;  %672 = vmatpush3.xpose.msk.msra.mxu1 %vm193_vm0, %v192_v2  ;;  %v186_v8 = vld [vmem:[%s925_s5 + $0x48] sm:$0xff]  ;;  %v185_v9 = vld [vmem:[%s925_s5 + $0x40] sm:$0xff]  ;;  %v184_v10 = vld [vmem:[%s925_s5 + $0x38] sm:$0xff]  ;;  %v393_v40 = vrot.slane %v1037_v39, %v392_v38 }
  0x1a   : > { %614 = vmatprep.subr.msk.mxu0 %vm193_vm0, %v191_v3  ;;  %657 = vmatprep.subr.msk.mxu1 %vm193_vm0, %v191_v3  ;;  %v183_v11 = vld [vmem:[%s925_s5 + $0x30] sm:$0xff]  ;;  %v182_v12 = vld [vmem:[%s925_s5 + $0x28] sm:$0xff]  ;;  %v181_v13 = vld [vmem:[%s925_s5 + $0x20] sm:$0xff] }
  0x1b   : > { %v180_v14 = vld [vmem:[%s925_s5 + $0x18] sm:$0xff]  ;;  %v179_v15 = vld [vmem:[%s925_s5 + $0x10] sm:$0xff]  ;;  %v178_v16 = vld [vmem:[%s925_s5 + $0x8] sm:$0xff] }
  0x1c   : > { %v177_v17 = vld [vmem:[%s925_s5] sm:$0xff]  ;;  %s163_s5 = scalar_lea.vmem [#allocation2], %s688_s30 }
  0x1d   : > { %615 = vmatpush3.xpose.msk.msra.mxu0 %vm193_vm0, %v191_v3  ;;  %673 = vmatpush3.xpose.msk.msra.mxu1 %vm193_vm0, %v191_v3  ;;  %v421_v3 = vrot.slane %v1037_v39, %v420_v1  ;;  %s492_s6 = sshll.u32 %s163_s5, 4  ;;  %s1053_s6 = int_to_ptr.vmem [resolvable:$true] %s492_s6 }
  0x1e   : > { %616 = vmatprep.subr.msk.mxu0 %vm193_vm0, %v190_v4  ;;  %658 = vmatprep.subr.msk.mxu1 %vm193_vm0, %v190_v4  ;;  %s779_s10 = scalar_lea.vmem %s1053_s6, 768  ;;  %p786_p0 = scmp.lt.s32.totalorder %s1053_s6, %s784_s17 }
  0x1f   : > { %p780_p11 = scmp.ne.s32.totalorder %s1053_s6, %s779_s10  ;;  %p787_p1 = scmp.lt.s32.totalorder %s785_s19, %s779_s10 }
  0x21   : > { %617 = vmatpush3.xpose.msk.msra.mxu0 %vm193_vm0, %v190_v4  ;;  %674 = vmatpush3.xpose.msk.msra.mxu1 %vm193_vm0, %v190_v4  ;;  %p781_p12 = pnand %p780_p11, %p902_p5  ;;  %p788_p2 = por %p787_p1, %p786_p0 }
  0x22   : > { %618 = vmatprep.subr.msk.mxu0 %vm193_vm0, %v189_v5  ;;  %659 = vmatprep.subr.msk.mxu1 %vm193_vm0, %v189_v5 }
  0x23   : > { %p782_p13 = pneg %p781_p12 }
  0x25   : > { %619 = vmatpush3.xpose.msk.msra.mxu0 %vm193_vm0, %v189_v5  ;;  %675 = vmatpush3.xpose.msk.msra.mxu1 %vm193_vm0, %v189_v5  ;;  %p789_p3 = pnand %p788_p2, %p782_p13 }
  0x26   : > { %620 = vmatprep.subr.msk.mxu0 %vm193_vm0, %v188_v6  ;;  %660 = vmatprep.subr.msk.mxu1 %vm193_vm0, %v188_v6 }
  0x29   : > { %621 = vmatpush3.xpose.msk.msra.mxu0 %vm193_vm0, %v188_v6  ;;  %676 = vmatpush3.xpose.msk.msra.mxu1 %vm193_vm0, %v188_v6 }
  0x2a   : > { %622 = vmatprep.subr.msk.mxu0 %vm193_vm0, %v187_v7  ;;  %661 = vmatprep.subr.msk.mxu1 %vm193_vm0, %v187_v7 }
  0x2d   : > { %623 = vmatpush3.xpose.msk.msra.mxu0 %vm193_vm0, %v187_v7  ;;  %677 = vmatpush3.xpose.msk.msra.mxu1 %vm193_vm0, %v187_v7 }
  0x2e   : > { %624 = vmatprep.subr.msk.mxu0 %vm193_vm0, %v186_v8  ;;  %662 = vmatprep.subr.msk.mxu1 %vm193_vm0, %v186_v8 }
  0x31   : > { %625 = vmatpush3.xpose.msk.msra.mxu0 %vm193_vm0, %v186_v8  ;;  %678 = vmatpush3.xpose.msk.msra.mxu1 %vm193_vm0, %v186_v8 }
  0x32   : > { %626 = vmatprep.subr.msk.mxu0 %vm193_vm0, %v185_v9  ;;  %663 = vmatprep.subr.msk.mxu1 %vm193_vm0, %v185_v9 }
  0x35   : > { %627 = vmatpush3.xpose.msk.msra.mxu0 %vm193_vm0, %v185_v9  ;;  %679 = vmatpush3.xpose.msk.msra.mxu1 %vm193_vm0, %v185_v9 }
  0x36   : > { %628 = vmatprep.subr.msk.mxu0 %vm193_vm0, %v184_v10  ;;  %664 = vmatprep.subr.msk.mxu1 %vm193_vm0, %v184_v10 }
  0x39   : > { %629 = vmatpush3.xpose.msk.msra.mxu0 %vm193_vm0, %v184_v10  ;;  %680 = vmatpush3.xpose.msk.msra.mxu1 %vm193_vm0, %v184_v10 }
  0x3a   : > { %630 = vmatprep.subr.msk.mxu0 %vm193_vm0, %v183_v11  ;;  %665 = vmatprep.subr.msk.mxu1 %vm193_vm0, %v183_v11 }
  0x3d   : > { %631 = vmatpush3.xpose.msk.msra.mxu0 %vm193_vm0, %v183_v11  ;;  %681 = vmatpush3.xpose.msk.msra.mxu1 %vm193_vm0, %v183_v11 }
  0x3e   : > { %632 = vmatprep.subr.msk.mxu0 %vm193_vm0, %v182_v12  ;;  %666 = vmatprep.subr.msk.mxu1 %vm193_vm0, %v182_v12 }
  0x41   : > { %633 = vmatpush3.xpose.msk.msra.mxu0 %vm193_vm0, %v182_v12  ;;  %682 = vmatpush3.xpose.msk.msra.mxu1 %vm193_vm0, %v182_v12 }
  0x42   : > { %634 = vmatprep.subr.msk.mxu0 %vm193_vm0, %v181_v13  ;;  %667 = vmatprep.subr.msk.mxu1 %vm193_vm0, %v181_v13 }
  0x45   : > { %635 = vmatpush3.xpose.msk.msra.mxu0 %vm193_vm0, %v181_v13  ;;  %683 = vmatpush3.xpose.msk.msra.mxu1 %vm193_vm0, %v181_v13 }
  0x46   : > { %636 = vmatprep.subr.msk.mxu0 %vm193_vm0, %v180_v14  ;;  %668 = vmatprep.subr.msk.mxu1 %vm193_vm0, %v180_v14 }
  0x49   : > { %637 = vmatpush3.xpose.msk.msra.mxu0 %vm193_vm0, %v180_v14  ;;  %684 = vmatpush3.xpose.msk.msra.mxu1 %vm193_vm0, %v180_v14 }
  0x4a   : > { %638 = vmatprep.subr.msk.mxu0 %vm193_vm0, %v179_v15  ;;  %669 = vmatprep.subr.msk.mxu1 %vm193_vm0, %v179_v15 }
  0x4d   : > { %639 = vmatpush3.xpose.msk.msra.mxu0 %vm193_vm0, %v179_v15  ;;  %685 = vmatpush3.xpose.msk.msra.mxu1 %vm193_vm0, %v179_v15 }
  0x4e   : > { %640 = vmatprep.subr.msk.mxu0 %vm193_vm0, %v178_v16  ;;  %670 = vmatprep.subr.msk.mxu1 %vm193_vm0, %v178_v16 }
  0x51   : > { %641 = vmatpush3.xpose.msk.msra.mxu0 %vm193_vm0, %v178_v16  ;;  %686 = vmatpush3.xpose.msk.msra.mxu1 %vm193_vm0, %v178_v16 }
  0x52   : > { %642 = vmatprep.subr.msk.mxu0 %vm193_vm0, %v177_v17  ;;  %671 = vmatprep.subr.msk.mxu1 %vm193_vm0, %v177_v17 }
  0x55   : > { %643 = vmatpush3.xpose.msk.msra.mxu0 %vm193_vm0, %v177_v17  ;;  %687 = vmatpush3.xpose.msk.msra.mxu1 %vm193_vm0, %v177_v17 }
  0x58   : > { %645 = vmatmul.mubr.msk.f32.vlgmr.msra.gmra.mxu0 %vm193_vm0, %v170_v18  ;;  %651 = vmatmul.mubr.msk.f32.vlgmr.msra.gmra.mxu1 %vm193_vm0, %v174_v19 }
  0x59   : > { %647 = vmatprep.mubr.msk.f32.mxu0 %vm193_vm0, %v171_v20  ;;  %653 = vmatprep.mubr.msk.f32.mxu1 %vm193_vm0, %v175_v21 }
  0x5c   : > { %648 = vmatmul.mubr.msk.f32.gmra.mxu0 %vm193_vm0, %v172_v22  ;;  %654 = vmatmul.mubr.msk.f32.gmra.mxu1 %vm193_vm0, %v176_v23  ;;  %v442_v23 = vsub.s32 2, %v1031_v36 }
 0x118   : > { %v646_v24 = vpop.f32.mrf.mxu0  ;;  %v652_v25 = vpop.f32.mrf.mxu1 }
 0x119   : > { %v373_v26 = vadd.f32 1e-05, %v646_v24  ;;  %v377_v27 = vadd.f32 1e-05, %v652_v25  ;;  %v443_v24 = vrot.slane %v1037_v39, %v442_v23 }
 0x11a   : > { %v332_v28 = vpop.f32.mrf.mxu0  ;;  %v352_v29 = vpop.f32.mrf.mxu1 }
 0x11b   : > { %731 = vlog2.f32 %v373_v26  ;;  %v372_v31 = vadd.f32 1e-05, %v332_v28  ;;  %v376_v32 = vadd.f32 1e-05, %v352_v29 }
 0x11c   : > { %733 = vlog2.f32 %v377_v27  ;;  %v649_v33 = vpop.f32.mrf.mxu0  ;;  %v655_v2 = vpop.f32.mrf.mxu1 }
 0x11d   : > { %735 = vlog2.f32 %v372_v31  ;;  %v375_v34 = vadd.f32 1e-05, %v649_v33 }
 0x11e   : > { %737 = vlog2.f32 %v376_v32  ;;  %v342_v35 = vpop.f32.mrf.mxu0  ;;  %v362_v5 = vpop.f32.mrf.mxu1 }
 0x11f   : > { %739 = vlog2.f32 %v375_v34  ;;  %v374_v37 = vadd.f32 1e-05, %v342_v35 }
 0x121   : > { %741 = vlog2.f32 %v374_v37 }
 0x128   : > { %v732_v41 = vpop.eup %731 }
 0x129   : > { %v734_v42 = vpop.eup %733  ;;  %v381_v43 = vmul.f32 0.6931472, %v732_v41 }
 0x12a   : > { %v736_v44 = vpop.eup %735  ;;  %v389_v45 = vmul.f32 0.6931472, %v734_v42 }
 0x12b   : > { %v738_v46 = vpop.eup %737  ;;  %v395_v47 = vmul.f32 %v393_v40, %v381_v43  ;;  %v379_v48 = vmul.f32 0.6931472, %v736_v44 }
 0x12c   : > { %v740_v49 = vpop.eup %739  ;;  %v399_v50 = vmul.f32 %v393_v40, %v389_v45  ;;  %v387_v51 = vmul.f32 0.6931472, %v738_v46 }
 0x12d   : > { %v402_v52 = vmul.f32 1.442695, %v395_v47  ;;  %v394_v53 = vmul.f32 %v393_v40, %v379_v48  ;;  %v385_v54 = vmul.f32 0.6931472, %v740_v49 }
 0x12e   : > { %v742_v55 = vpop.eup %741  ;;  %v410_v56 = vmul.f32 1.442695, %v399_v50  ;;  %v398_v57 = vmul.f32 %v393_v40, %v387_v51  ;;  %v464_v51 = vsub.s32 3, %v1031_v36 }
 0x12f   : > { %743 = vpow2.f32 %v402_v52  ;;  %v400_v58 = vmul.f32 1.442695, %v394_v53  ;;  %v397_v59 = vmul.f32 %v393_v40, %v385_v54  ;;  %v383_v60 = vmul.f32 0.6931472, %v742_v55 }
 0x130   : > { %745 = vpow2.f32 %v410_v56  ;;  %v408_v61 = vmul.f32 1.442695, %v398_v57  ;;  %v465_v52 = vrot.slane %v1037_v39, %v464_v51 }
 0x131   : > { %747 = vpow2.f32 %v400_v58  ;;  %v406_v62 = vmul.f32 1.442695, %v397_v59  ;;  %v396_v63 = vmul.f32 %v393_v40, %v383_v60 }
 0x132   : > { %749 = vpow2.f32 %v408_v61 }
 0x133   : > { %751 = vpow2.f32 %v406_v62  ;;  %v404_v0 = vmul.f32 1.442695, %v396_v63 }
 0x135   : > { %753 = vpow2.f32 %v404_v0 }
 0x13c   : > { %v744_v4 = vpop.eup %743 }
 0x13d   : > { %v746_v6 = vpop.eup %745  ;;  %v413_v7 = vmul.f32 %v744_v4, %v655_v2 }
 0x13e   : > { %v748_v8 = vpop.eup %747  ;;  %v417_v9 = vmul.f32 %v746_v6, %v655_v2 }
 0x13f   : > { %v750_v10 = vpop.eup %749  ;;  %v423_v11 = vadd.f32 %v421_v3, %v413_v7  ;;  %v412_v12 = vmul.f32 %v748_v8, %v362_v5 }
 0x140   : > { %v752_v13 = vpop.eup %751  ;;  %v427_v14 = vadd.f32 %v421_v3, %v417_v9  ;;  %v416_v15 = vmul.f32 %v750_v10, %v362_v5 }
 0x141   : > { %v415_v16 = vmul.f32 %v752_v13, %v655_v2  ;;  %755 = vlog2.f32 %v423_v11  ;;  %v422_v17 = vadd.f32 %v421_v3, %v412_v12 }
 0x142   : > { %v754_v18 = vpop.eup %753  ;;  %757 = vlog2.f32 %v427_v14  ;;  %v426_v19 = vadd.f32 %v421_v3, %v416_v15 }
 0x143   : > { %v425_v20 = vadd.f32 %v421_v3, %v415_v16  ;;  %v414_v21 = vmul.f32 %v754_v18, %v362_v5  ;;  %759 = vlog2.f32 %v422_v17 }
 0x144   : > { %761 = vlog2.f32 %v426_v19 }
 0x145   : > { %763 = vlog2.f32 %v425_v20  ;;  %v424_v22 = vadd.f32 %v421_v3, %v414_v21 }
 0x147   : > { %765 = vlog2.f32 %v424_v22 }
 0x14e   : > { %v756_v25 = vpop.eup %755 }
 0x14f   : > { %v758_v26 = vpop.eup %757  ;;  %v431_v27 = vmul.f32 0.6931472, %v756_v25 }
 0x150   : > { %v760_v28 = vpop.eup %759  ;;  %v439_v29 = vmul.f32 0.6931472, %v758_v26 }
 0x151   : > { %v762_v30 = vpop.eup %761  ;;  %v445_v31 = vmul.f32 %v443_v24, %v431_v27  ;;  %v429_v32 = vmul.f32 0.6931472, %v760_v28 }
 0x152   : > { %v764_v33 = vpop.eup %763  ;;  %v449_v34 = vmul.f32 %v443_v24, %v439_v29  ;;  %v437_v35 = vmul.f32 0.6931472, %v762_v30 }
 0x153   : > { %v435_v37 = vmul.f32 0.6931472, %v764_v33  ;;  %v452_v38 = vmul.f32 1.442695, %v445_v31  ;;  %v444_v40 = vmul.f32 %v443_v24, %v429_v32 }
 0x154   : > { %v766_v41 = vpop.eup %765  ;;  %v460_v42 = vmul.f32 1.442695, %v449_v34  ;;  %v448_v43 = vmul.f32 %v443_v24, %v437_v35 }
 0x155   : > { %v447_v44 = vmul.f32 %v443_v24, %v435_v37  ;;  %767 = vpow2.f32 %v452_v38  ;;  %v433_v45 = vmul.f32 0.6931472, %v766_v41  ;;  %v450_v46 = vmul.f32 1.442695, %v444_v40 }
 0x156   : > { %769 = vpow2.f32 %v460_v42  ;;  %v458_v47 = vmul.f32 1.442695, %v448_v43 }
 0x157   : > { %v456_v48 = vmul.f32 1.442695, %v447_v44  ;;  %v446_v49 = vmul.f32 %v443_v24, %v433_v45  ;;  %771 = vpow2.f32 %v450_v46 }
 0x158   : > { %773 = vpow2.f32 %v458_v47 }
 0x159   : > { %775 = vpow2.f32 %v456_v48  ;;  %v454_v50 = vmul.f32 1.442695, %v446_v49 }
 0x15b   : > { %777 = vpow2.f32 %v454_v50 }
 0x162   : > { %v768_v53 = vpop.eup %767 }
 0x163   : > { %v770_v54 = vpop.eup %769  ;;  %v467_v55 = vsub.f32 %v768_v53, %v465_v52 }
 0x164   : > { %v772_v56 = vpop.eup %771  ;;  %v471_v57 = vsub.f32 %v770_v54, %v465_v52 }
 0x165   : > { %v774_v58 = vpop.eup %773  ;;  %473 = vst [vmem:[%s163_s5 + $0x8] sm:$0xff] %v467_v55  ;;  %v466_v59 = vsub.f32 %v772_v56, %v465_v52 }
 0x166   : > { %v776_v60 = vpop.eup %775  ;;  %477 = vst [vmem:[%s163_s5 + $0x28] sm:$0xff] %v471_v57  ;;  %v470_v36 = vsub.f32 %v774_v58, %v465_v52 }
 0x167   : > { %v469_v61 = vsub.f32 %v776_v60, %v465_v52  ;;  %472 = vst [vmem:[%s163_s5] sm:$0xff] %v466_v59 }
 0x168   : > { %v778_v62 = vpop.eup %777  ;;  %476 = vst [vmem:[%s163_s5 + $0x20] sm:$0xff] %v470_v36 }
 0x169   : > { %475 = vst [vmem:[%s163_s5 + $0x18] sm:$0xff] %v469_v61  ;;  %v468_v39 = vsub.f32 %v778_v62, %v465_v52 }
 0x16b   : > { %474 = vst [vmem:[%s163_s5 + $0x10] sm:$0xff] %v468_v39 }
 0x16c   : > { %792 = shalt.err (!%p789_p3)
}
 0x16d   : > { %s793_s20 = scalar_lea.hbm %s1051_s9, 768  ;;  %s797_s26 = scalar_lea.hbm %s1098_s3, 1536 }
 0x16e   : > { %p794_p4 = scmp.ne.s32.totalorder %s1051_s9, %s793_s20  ;;  %p798_p9 = scmp.lt.s32.totalorder %s1051_s9, %s1098_s3 }
 0x16f   : > { %p799_p10 = scmp.lt.s32.totalorder %s797_s26, %s793_s20 }
 0x170   : > { %p795_p7 = pnand %p794_p4, %p902_p5 }
 0x171   : > { %p800_p11 = por %p799_p10, %p798_p9 }
 0x172   : > { %p796_p8 = pneg %p795_p7 }
 0x174   : > { %p801_p12 = pnand %p800_p11, %p796_p8 }
 0x176   : > { %804 = shalt.err (!%p801_p12)
}
 0x177   : > { %s842_s29 = smov 128   ;;  %s843_s30 = smov 8  }
 0x178   : > { %690 = dma.vmem_to_hbm [thread:$0]  (%p902_p5), %s1053_s6, 768, %s1051_s9, %s1055_s16, %s842_s29, %s842_s29, %s843_s30  }
 0x179 PF: > { %p696_p13 = scmp.ge.s32.totalorder %s839_s15, 2  ;;  %s507_s4 = sand.u32 1, %s827_s12  }
 0x17a   : > { %s508_s5 = scalar_lea.sflag [#allocation3], %s507_s4 }
 0x17b   : > { %p693_p0 = pnand %p696_p13, %p906_p6 }
 0x17d   : > { %p694_p1 = pneg %p693_p0 }
 0x17f   : > { %822 = dma.done.wait (%p694_p1), %s508_s5, 768  }
 0x180   : > { %824 = vsyncadd (%p694_p1), %s508_s5, 4294966528  ;;  %p13_p2 = scmp.ge.s32.totalorder %s889_s18, 4   ;;  %s1101_s12 = smov %s831_s13 }
 0x181   : > { %s1102_s13 = smov %s835_s14  ;;  %s1103_s14 = smov %s900_s21 }
 0x182   : > { %s1104_s15 = smov %s889_s18  ;;  %15 = sbr.rel (!%p13_p2) target bundleno = 3 (0x3), region = 67 }
 0x187   :  { %513 = vsyncpa [#allocation3], 1 }
 0x188   :  { %515 = vsyncpa [#allocation3 + $0x1], 1 }

</bundles_post_ra>
